<compile_context>
chip_gen: v7x
topology: tpu7x:2x2x1
jax: 0.10.0
libtpu: 0.0.40
codegen_flags: <defaults>
</compile_context>

<pallas_src>
import math

import jax
import jax.numpy as jnp
from jax.experimental import pallas as pl
from jax.experimental.pallas import tpu as pltpu

_LANE = 128
_SUBLANE = 8


# ----------------------------- kernels ------------------------------------- #

def _add_kernel(x_ref, y_ref, o_ref):
    # Elementwise add on the VPU; dtype promotion happens in-vreg (free).
    o_ref[...] = x_ref[...].astype(o_ref.dtype) + y_ref[...].astype(o_ref.dtype)


def _add_scalar_kernel(s_ref, x_ref, o_ref):
    # Tensor + scalar: the scalar lives in SMEM and is splatted on the VPU,
    # so the broadcast operand is never materialized in HBM.
    s = s_ref[0].astype(o_ref.dtype)
    o_ref[...] = x_ref[...].astype(o_ref.dtype) + s


# --------------------------- tiling helpers --------------------------------- #

def _alignment_rows(min_itemsize):
    # Packed-sublane quantum: 8 rows for 32-bit, 16 for 16-bit, 32 for 8-bit.
    return _SUBLANE * max(1, 4 // max(1, int(min_itemsize)))


def _target_tile_rows(align, max_itemsize):
    # ~1 MiB per input block: already at the HBM roofline, and the
    # double-buffered working set stays inside the default scoped-VMEM limit
    # on all generations -> no vmem_limit_bytes override needed anywhere.
    target_bytes = 1 << 20
    rows = (target_bytes // (_LANE * int(max_itemsize))) // align * align
    return max(align, rows)


def _flatten_lane_dense(a, n):
    """Flatten to a (rows, 128) lane-dense slab, padding only to a 128 multiple."""
    flat = a.reshape(n)
    pad = (-n) % _LANE
    if pad:
        flat = jnp.pad(flat, (0, pad))
    rows = (n + pad) // _LANE
    return flat.reshape(rows, _LANE), rows, pad


def _pick_tile_rows(rows, align, target_rows):
    if rows <= target_rows:
        return rows          # single block == full array extent (always legal)
    return target_rows       # aligned; ragged last grid block handled by Pallas


def _pure_leading_broadcast(small_shape, out_shape):
    """True iff `small` broadcasts to `out` purely along leading axes."""
    s = (1,) * (len(out_shape) - len(small_shape)) + tuple(small_shape)
    o = tuple(out_shape)
    for cut in range(len(s) + 1):
        if all(d == 1 for d in s[:cut]) and s[cut:] == o[cut:]:
            return True
    return False


def _pick_bcast_tile(rows_b, align, target_rows):
    """Largest aligned tile that divides the broadcast operand's row count."""
    if rows_b % align != 0:
        return None
    if rows_b <= target_rows:
        return rows_b
    t = (target_rows // align) * align
    while t >= align:
        if rows_b % t == 0:
            return t
        t -= align
    return None


# --------------------------- pallas_call wrappers --------------------------- #

def _tiled_add_2d(x2, y2, rows, tile, out_dtype):
    return pl.pallas_call(
        _add_kernel,
        out_shape=jax.ShapeDtypeStruct((rows, _LANE), out_dtype),
        grid_spec=pltpu.PrefetchScalarGridSpec(
            num_scalar_prefetch=0,
            grid=(pl.cdiv(rows, tile),),
            in_specs=[
                pl.BlockSpec((tile, _LANE), lambda i: (i, 0)),
                pl.BlockSpec((tile, _LANE), lambda i: (i, 0)),
            ],
            out_specs=pl.BlockSpec((tile, _LANE), lambda i: (i, 0)),
        ),
        compiler_params=pltpu.CompilerParams(
            dimension_semantics=("parallel",),
        ),
    )(x2, y2)


def _tiled_add_scalar_2d(t2, scalar, rows, tile, out_dtype):
    od = jnp.dtype(out_dtype)
    if jnp.issubdtype(od, jnp.floating):
        smem_dtype = jnp.float32
    elif jnp.issubdtype(od, jnp.unsignedinteger):
        smem_dtype = jnp.uint32
    else:
        smem_dtype = jnp.int32
    s1 = jnp.asarray(scalar).reshape(1).astype(smem_dtype)
    return pl.pallas_call(
        _add_scalar_kernel,
        out_shape=jax.ShapeDtypeStruct((rows, _LANE), out_dtype),
        grid_spec=pltpu.PrefetchScalarGridSpec(
            num_scalar_prefetch=0,
            grid=(pl.cdiv(rows, tile),),
            in_specs=[
                pl.BlockSpec(memory_space=pltpu.MemorySpace.SMEM),
                pl.BlockSpec((tile, _LANE), lambda i: (i, 0)),
            ],
            out_specs=pl.BlockSpec((tile, _LANE), lambda i: (i, 0)),
        ),
        compiler_params=pltpu.CompilerParams(
            dimension_semantics=("parallel",),
        ),
    )(s1, t2)


def _tiled_add_bcast_2d(big2, small2, rows, rows_b, tile_b, out_dtype):
    # Leading-axis broadcast via index_map: the small operand's blocks are
    # re-fetched from their original (un-broadcast) HBM extent, so total HBM
    # traffic stays at big + small + out (no broadcast_to pass).
    inner = rows_b // tile_b
    repeat = rows // rows_b
    return pl.pallas_call(
        _add_kernel,
        out_shape=jax.ShapeDtypeStruct((rows, _LANE), out_dtype),
        grid_spec=pltpu.PrefetchScalarGridSpec(
            num_scalar_prefetch=0,
            grid=(repeat, inner),
            in_specs=[
                pl.BlockSpec((tile_b, _LANE), lambda r, i: (r * inner + i, 0)),
                pl.BlockSpec((tile_b, _LANE), lambda r, i: (i, 0)),
            ],
            out_specs=pl.BlockSpec((tile_b, _LANE), lambda r, i: (r * inner + i, 0)),
        ),
        compiler_params=pltpu.CompilerParams(
            dimension_semantics=("parallel", "parallel"),
        ),
    )(big2, small2)


# ------------------------------- public op ---------------------------------- #

def pallas_add(x, y):
    """AddModel.forward: elementwise x + y (with broadcasting) via Pallas TPU."""
    x = jnp.asarray(x)
    y = jnp.asarray(y)
    out_shape = jnp.broadcast_shapes(x.shape, y.shape)
    # result_type on VALUES keeps weak-type info, matching PyTorch's
    # "tensor dtype wins over a Python scalar" promotion (bf16 + 1.5 -> bf16).
    out_dtype = jnp.result_type(x, y)
    n = int(math.prod(out_shape))
    if n == 0:
        return jnp.zeros(out_shape, out_dtype)

    itemsizes = (x.dtype.itemsize, y.dtype.itemsize, jnp.dtype(out_dtype).itemsize)
    align = _alignment_rows(min(itemsizes))
    target_rows = _target_tile_rows(align, max(itemsizes))

    pad = 0
    if x.shape == y.shape:
        x2, rows, pad = _flatten_lane_dense(x, n)
        y2, _, _ = _flatten_lane_dense(y, n)
        tile = _pick_tile_rows(rows, align, target_rows)
        out2 = _tiled_add_2d(x2, y2, rows, tile, out_dtype)
    elif x.size == 1 or y.size == 1:
        tensor, scalar = (x, y) if y.size == 1 else (y, x)
        t2, rows, pad = _flatten_lane_dense(tensor, n)
        tile = _pick_tile_rows(rows, align, target_rows)
        out2 = _tiled_add_scalar_2d(t2, scalar, rows, tile, out_dtype)
    else:
        big, small = (
            (x, y) if x.size == n else (y, x) if y.size == n else (None, None)
        )
        tile_b = None
        if (
            big is not None
            and small.size % _LANE == 0
            and _pure_leading_broadcast(small.shape, out_shape)
        ):
            tile_b = _pick_bcast_tile(small.size // _LANE, align, target_rows)
        if tile_b is not None:
            big2, rows, pad = _flatten_lane_dense(big, n)
            small2, rows_b, _ = _flatten_lane_dense(small, int(small.size))
            out2 = _tiled_add_bcast_2d(big2, small2, rows, rows_b, tile_b, out_dtype)
        else:
            # TODO(synk): express the remaining broadcast patterns (interior
            # broadcast axes, sub-128-element broadcast operands) via BlockSpec
            # index_maps / in-kernel splats instead of an HBM broadcast pass.
            xb = x if x.shape == out_shape else jnp.broadcast_to(x, out_shape)
            yb = y if y.shape == out_shape else jnp.broadcast_to(y, out_shape)
            x2, rows, pad = _flatten_lane_dense(xb, n)
            y2, _, _ = _flatten_lane_dense(yb, n)
            tile = _pick_tile_rows(rows, align, target_rows)
            out2 = _tiled_add_2d(x2, y2, rows, tile, out_dtype)

    if pad:
        return out2.reshape(-1)[:n].reshape(out_shape)
    return out2.reshape(out_shape)


if __name__ == "__main__":
    key = jax.random.PRNGKey(0)
    kx, ky, kz, kb = jax.random.split(key, 4)

    # Small NCHW-style shapes consistent with AddModel: (B=2, C=4, H=16, W=16)
    x = jax.random.normal(kx, (2, 4, 16, 16), dtype=jnp.float32)
    y = jax.random.normal(ky, (2, 4, 16, 16), dtype=jnp.float32)

    out = pallas_add(x, y)
    jax.block_until_ready(out)
    ref = x + y
    assert out.shape == ref.shape and out.dtype == ref.dtype
    assert jnp.allclose(out, ref, atol=1e-6, rtol=1e-6)

    # Tensor + Python scalar (in-kernel SMEM splat, no HBM broadcast).
    out_s = pallas_add(x, 1.5)
    jax.block_until_ready(out_s)
    ref_s = x + 1.5
    assert out_s.shape == ref_s.shape and out_s.dtype == ref_s.dtype
    assert jnp.allclose(out_s, ref_s, atol=1e-6, rtol=1e-6)

    # Leading-axis broadcast handled via index_map block reuse (no broadcast_to).
    b = jax.random.normal(kb, (1, 4, 16, 16), dtype=jnp.float32)
    out_b = pallas_add(x, b)
    jax.block_until_ready(out_b)
    ref_b = x + b
    assert out_b.shape == ref_b.shape and out_b.dtype == ref_b.dtype
    assert jnp.allclose(out_b, ref_b, atol=1e-6, rtol=1e-6)

    # Irregular (non-128-multiple) size: minimal lane padding, ragged row tiles.
    z = jax.random.normal(kz, (3, 5, 7), dtype=jnp.float32)
    out_z = pallas_add(z, z)
    jax.block_until_ready(out_z)
    assert jnp.allclose(out_z, z + z, atol=1e-6, rtol=1e-6)

    print("KERNEL_OK")
</pallas_src>

<mosaic_0001>
module attributes {stable_mosaic.version = 11 : i64} {
  func.func @_add_kernel(%arg0: i32, %arg1: memref<16x128xf32, #tpu.memory_space<vmem>>, %arg2: memref<16x128xf32, #tpu.memory_space<vmem>>, %arg3: memref<16x128xf32, #tpu.memory_space<vmem>>) attributes {dimension_semantics = [#tpu.dimension_semantics<parallel>], iteration_bounds = array<i64: 1>, scalar_prefetch = 0 : i64, scratch_operands = 0 : i64, tpu.core_type = #tpu.core_type<tc>, window_params = [{transform_indices = @transform_0, window_bounds = array<i64: 16, 128>}, {transform_indices = @transform_1, window_bounds = array<i64: 16, 128>}, {transform_indices = @transform_2, window_bounds = array<i64: 16, 128>}]} {
    %c0 = arith.constant 0 : index
    %c0_0 = arith.constant 0 : index
    %0 = vector.load %arg1[%c0, %c0_0] : memref<16x128xf32, #tpu.memory_space<vmem>>, vector<16x128xf32>
    %c0_1 = arith.constant 0 : index
    %c0_2 = arith.constant 0 : index
    %1 = vector.load %arg2[%c0_1, %c0_2] : memref<16x128xf32, #tpu.memory_space<vmem>>, vector<16x128xf32>
    %2 = arith.addf %0, %1 : vector<16x128xf32>
    %c0_3 = arith.constant 0 : index
    %c0_4 = arith.constant 0 : index
    %3 = vector.load %arg3[%c0_3, %c0_4] : memref<16x128xf32, #tpu.memory_space<vmem>>, vector<16x128xf32>
    tpu.vector_store %arg3[%c0_3, %c0_4], %2 {strides = array<i32>} : memref<16x128xf32, #tpu.memory_space<vmem>>, vector<16x128xf32>,
    return
  }
  func.func @transform_0(%arg0: i32) -> (i32, i32) {
    %c0_i32 = arith.constant 0 : i32
    %c0_i32_0 = arith.constant 0 : i32
    return %arg0, %c0_i32 : i32, i32
  }
  func.func @transform_1(%arg0: i32) -> (i32, i32) {
    %c0_i32 = arith.constant 0 : i32
    %c0_i32_0 = arith.constant 0 : i32
    return %arg0, %c0_i32 : i32, i32
  }
  func.func @transform_2(%arg0: i32) -> (i32, i32) {
    %c0_i32 = arith.constant 0 : i32
    %c0_i32_0 = arith.constant 0 : i32
    return %arg0, %c0_i32 : i32, i32
  }
}

</mosaic_0001>

<bundles_post_ra>
// kernel: tpu_custom_call.1
= control target key start
LH: loop header
LB: loop body
LE: loop exit
PB: predicated region body
PF: predicated region fallthrough
CT: control target
= control target key end

     0   :  { %7 = vsyncpa [#allocation3], 0  ;;  %s208_s0 = inlined_call_operand.hbm [shape: f32[16,128], index: 0, kind: input, shape index: {}]   ;;  %s209_s1 = inlined_call_operand.hbm [shape: f32[16,128], index: 1, kind: input, shape index: {}]   ;;  %s210_s2 = inlined_call_operand.hbm [shape: f32[16,128], index: 2, kind: output, shape index: {}]  }
   0x1   :  { %8 = vsyncpa [#allocation6], 0 }
   0x2   :  { %9 = vsyncpa [#allocation4], 0  ;;  %s143_s9 = smov [#allocation2]   ;;  %s71_s13 = scalar_lea.hbm %s208_s0, 256 }
   0x3   :  { %s15_s10 = sshll.u32 %s143_s9, 4  ;;  %p72_p0 = scmp.ne.s32.totalorder %s208_s0, %s71_s13  ;;  %s16_s10 = int_to_ptr.vmem [resolvable:$true] %s15_s10 }
   0x4   :  { %p75_p1 = scmp.lt.u32.totalorder %s71_s13, %s208_s0 }
   0x6   :  { %p77_p2 = pnand %p75_p1, %p72_p0 }
   0x8   :  { %80 = shalt.err (!%p77_p2)
}
   0x9   :  { %s81_s18 = scalar_lea.vmem %s16_s10, 256  ;;  %p86_p4 = scmp.lt.s32.totalorder %s16_s10, %s16_s10 }
   0xa   :  { %p82_p3 = scmp.ne.s32.totalorder %s16_s10, %s81_s18  ;;  %p87_p5 = scmp.lt.s32.totalorder %s81_s18, %s81_s18 }
   0xc   :  { %p88_p6 = por %p87_p5, %p86_p4 }
   0xe   :  { %p89_p7 = pnand %p88_p6, %p82_p3 }
  0x10   :  { %92 = shalt.err (!%p89_p7)
}
  0x11   :  { %s144_s19 = smov 128   ;;  %s145_s20 = smov 8  }
  0x12   :  { %21 = dma.hbm_to_vmem [thread:$0]  %s208_s0, 256, %s16_s10, [#allocation3], %s144_s19, %s144_s19, %s145_s20  }
  0x13   :  { %s146_s23 = smov [#allocation5]   ;;  %s93_s27 = scalar_lea.hbm %s209_s1, 256 }
  0x14   :  { %s27_s24 = sshll.u32 %s146_s23, 4  ;;  %p94_p8 = scmp.ne.s32.totalorder %s209_s1, %s93_s27  ;;  %s28_s24 = int_to_ptr.vmem [resolvable:$true] %s27_s24 }
  0x15   :  { %p97_p9 = scmp.lt.u32.totalorder %s93_s27, %s209_s1 }
  0x17   :  { %p99_p10 = pnand %p97_p9, %p94_p8 }
  0x19   :  { %102 = shalt.err (!%p99_p10)
}
  0x1a   :  { %s103_s4 = scalar_lea.vmem %s28_s24, 256  ;;  %p108_p12 = scmp.lt.s32.totalorder %s28_s24, %s28_s24 }
  0x1b   :  { %p104_p11 = scmp.ne.s32.totalorder %s28_s24, %s103_s4  ;;  %p109_p13 = scmp.lt.s32.totalorder %s103_s4, %s103_s4 }
  0x1d   :  { %p110_p0 = por %p109_p13, %p108_p12 }
  0x1f   :  { %p111_p1 = pnand %p110_p0, %p104_p11 }
  0x21   :  { %114 = shalt.err (!%p111_p1)
}
  0x22   :  { %33 = dma.hbm_to_vmem [thread:$0]  %s209_s1, 256, %s28_s24, [#allocation6], %s144_s19, %s144_s19, %s145_s20  }
  0x23   :  { %137 = dma.done.wait [#allocation3], 256  }
  0x24   :  { %138 = vsyncadd [#allocation3], 4294967040 }
  0x25   :  { %139 = dma.done.wait [#allocation6], 256  }
  0x26   :  { %140 = vsyncadd [#allocation6], 4294967040  ;;  %s147_s6 = smov [#allocation7]   ;;  %v40_v0 = vld [vmem:[#allocation2] sm:$0xff]  ;;  %v42_v1 = vld [vmem:[#allocation5] sm:$0xff] }
  0x27   :  { %s53_s7 = sshll.u32 %s147_s6, 4  ;;  %v41_v2 = vld [vmem:[#allocation2 + $0x8] sm:$0xff]  ;;  %v44_v3 = vadd.f32 %v42_v1, %v40_v0  ;;  %v43_v4 = vld [vmem:[#allocation5 + $0x8] sm:$0xff]  ;;  %s54_s7 = int_to_ptr.vmem [resolvable:$true] %s53_s7 }
  0x28   :  { %v45_v5 = vadd.f32 %v43_v4, %v41_v2  ;;  %s115_s8 = scalar_lea.vmem %s54_s7, 256  ;;  %p120_p3 = scmp.lt.s32.totalorder %s54_s7, %s54_s7 }
  0x29   :  { %46 = vst [vmem:[#allocation7] sm:$0xff] %v44_v3  ;;  %p116_p2 = scmp.ne.s32.totalorder %s54_s7, %s115_s8  ;;  %p121_p4 = scmp.lt.s32.totalorder %s115_s8, %s115_s8 }
  0x2a   :  { %47 = vst [vmem:[#allocation7 + $0x8] sm:$0xff] %v45_v5 }
  0x2b   :  { %p122_p5 = por %p121_p4, %p120_p3 }
  0x2d   :  { %p123_p6 = pnand %p122_p5, %p116_p2 }
  0x2f   :  { %126 = shalt.err (!%p123_p6)
}
  0x30   :  { %s127_s10 = scalar_lea.hbm %s210_s2, 256 }
  0x31   :  { %p128_p7 = scmp.ne.s32.totalorder %s210_s2, %s127_s10  ;;  %p131_p8 = scmp.lt.u32.totalorder %s127_s10, %s210_s2 }
  0x33   :  { %p133_p9 = pnand %p131_p8, %p128_p7 }
  0x35   :  { %136 = shalt.err (!%p133_p9)
}
  0x36   :  { %59 = dma.vmem_to_hbm [thread:$0]  %s54_s7, 256, %s210_s2, [#allocation4], %s144_s19, %s144_s19, %s145_s20  }
  0x37   :  { %141 = dma.done.wait [#allocation4], 256  }
  0x38   :  { %142 = vsyncadd [#allocation4], 4294967040 }
  0x39   :  { %63 = vsyncpa [#allocation3], 1 }
  0x3a   :  { %64 = vsyncpa [#allocation6], 1 }
  0x3b   :  { %65 = vsyncpa [#allocation4], 1 }

</bundles_post_ra>
